<compile_context>
chip_gen: v5e
topology: v5e:2x2
jax: 0.10.0
libtpu: 0.0.40
codegen_flags: <defaults>
</compile_context>

<pallas_src>
import jax
import jax.numpy as jnp
from jax.experimental import pallas as pl
from jax.experimental.pallas import tpu as pltpu


def _round_up(x, m):
    return (x + m - 1) // m * m


# ----------------------------------------------------------------------------
# Fused kernel: all backbones + concat + cosine classifier
# ----------------------------------------------------------------------------
def _fused_forward_kernel(x_ref, w1_ref, b1_ref, w2_ref, b2_ref, wc_ref,
                          att_ref, logits_ref):
    """Shapes (all padded, lane/sublane aligned):
      x_ref:      (B_pad, D_pad)          f32
      w1_ref:     (n_nets, D_pad, H_pad)  bf16
      b1_ref:     (n_nets, 1, H_pad)      f32
      w2_ref:     (n_nets, H_pad, O_pad)  bf16
      b2_ref:     (n_nets, 1, O_pad)      f32
      wc_ref:     (n_nets*O_pad, C_pad)   f32   (classifier weight, pre-transposed)
      att_ref:    (B_pad, n_nets*O_pad)   f32
      logits_ref: (B_pad, C_pad)          f32
    """
    n_nets = w1_ref.shape[0]
    o_pad = w2_ref.shape[2]
    b_pad = x_ref.shape[0]
    c_pad = wc_ref.shape[1]
    eps2 = jnp.float32(1e-24)                      # (F.normalize eps = 1e-12)**2

    x = x_ref[...].astype(jnp.bfloat16)            # (B_pad, D_pad)

    # ---- backbones: x @ W1 + b1 -> ReLU -> @ W2 + b2 (remove_last_relu) ----
    feats = []
    sumsq = jnp.zeros((b_pad, 1), jnp.float32)
    for i in range(n_nets):
        h = jnp.dot(x, w1_ref[i], preferred_element_type=jnp.float32)
        h = jnp.maximum(h + b1_ref[i], 0.0)        # bias + ReLU, fused in-kernel
        f = jnp.dot(h.astype(jnp.bfloat16), w2_ref[i],
                    preferred_element_type=jnp.float32) + b2_ref[i]
        # write this backbone's slice of the concatenated attentions
        att_ref[:, pl.ds(i * o_pad, o_pad)] = f
        sumsq = sumsq + jnp.sum(f * f, axis=1, keepdims=True)
        feats.append(f)

    # ---- cosine classifier: normalize(att, dim=1) @ normalize(W, dim=1).T ----
    # W is pre-transposed to (F, C); per-class norm = per-column norm.
    w = wc_ref[...]
    w_inv = jax.lax.rsqrt(jnp.maximum(jnp.sum(w * w, axis=0, keepdims=True), eps2))
    w_n = (w * w_inv).astype(jnp.bfloat16)

    acc = jnp.zeros((b_pad, c_pad), jnp.float32)
    for i in range(n_nets):
        acc = acc + jnp.dot(feats[i].astype(jnp.bfloat16),
                            w_n[i * o_pad:(i + 1) * o_pad, :],
                            preferred_element_type=jnp.float32)
    # row-normalization factor commutes with the (linear) matmul
    a_inv = jax.lax.rsqrt(jnp.maximum(sumsq, eps2))
    logits_ref[...] = acc * a_inv


# ----------------------------------------------------------------------------
# Wrapper: pad / pack (layout plumbing only), single pallas_call, slice back
# ----------------------------------------------------------------------------
@jax.jit
def expandable_net_forward(x, backbone_params, classifier_weight):
    B, input_dim = x.shape
    n_nets = len(backbone_params)
    hidden_dim = backbone_params[0][0].shape[1]
    out_dim = backbone_params[0][2].shape[1]
    n_classes = classifier_weight.shape[0]

    B_pad = _round_up(max(B, 8), 8)
    D_pad = _round_up(input_dim, 128)
    H_pad = _round_up(hidden_dim, 128)
    O_pad = _round_up(out_dim, 128)
    C_pad = _round_up(n_classes, 128)
    F_pad = n_nets * O_pad

    x_p = jnp.zeros((B_pad, D_pad), jnp.float32).at[:B, :input_dim].set(x)

    w1s, b1s, w2s, b2s = [], [], [], []
    for (w1, b1, w2, b2) in backbone_params:
        w1s.append(jnp.pad(w1, ((0, D_pad - input_dim),
                                (0, H_pad - hidden_dim))).astype(jnp.bfloat16))
        b1s.append(jnp.pad(b1.reshape(1, hidden_dim),
                           ((0, 0), (0, H_pad - hidden_dim))).astype(jnp.float32))
        w2s.append(jnp.pad(w2, ((0, H_pad - hidden_dim),
                                (0, O_pad - out_dim))).astype(jnp.bfloat16))
        b2s.append(jnp.pad(b2.reshape(1, out_dim),
                           ((0, 0), (0, O_pad - out_dim))).astype(jnp.float32))
    w1_all = jnp.stack(w1s)                         # (n_nets, D_pad, H_pad) bf16
    b1_all = jnp.stack(b1s)                         # (n_nets, 1, H_pad)    f32
    w2_all = jnp.stack(w2s)                         # (n_nets, H_pad, O_pad) bf16
    b2_all = jnp.stack(b2s)                         # (n_nets, 1, O_pad)    f32

    # classifier weight (n_classes, n_nets*out_dim), torch layout
    # -> pre-transposed (F_pad, C_pad), per-net 128-aligned row blocks
    wc_blocks = []
    for i in range(n_nets):
        blk = classifier_weight[:, i * out_dim:(i + 1) * out_dim].T  # (out_dim, C)
        wc_blocks.append(jnp.pad(blk, ((0, O_pad - out_dim),
                                       (0, C_pad - n_classes))))
    wc_t = jnp.concatenate(wc_blocks, axis=0).astype(jnp.float32)    # (F_pad, C_pad)

    vmem = pl.BlockSpec(memory_space=pltpu.MemorySpace.VMEM)
    att_p, logits_p = pl.pallas_call(
        _fused_forward_kernel,
        out_shape=(jax.ShapeDtypeStruct((B_pad, F_pad), jnp.float32),
                   jax.ShapeDtypeStruct((B_pad, C_pad), jnp.float32)),
        in_specs=[vmem] * 6,
        out_specs=(vmem, vmem),
    )(x_p, w1_all, b1_all, w2_all, b2_all, wc_t)

    attentions = jnp.concatenate(
        [att_p[:B, i * O_pad:i * O_pad + out_dim] for i in range(n_nets)], axis=1)
    logits = logits_p[:B, :n_classes]
    return {"attentions": attentions, "logits": logits}


# ----------------------------------------------------------------------------
# Deterministic synthetic parameters (torch-like init, kept in float32)
# ----------------------------------------------------------------------------
def init_params(key, n_nets, input_dim, hidden_dim, out_dim, n_classes):
    backbone_params = []
    for _ in range(n_nets):
        k1, k2, key = jax.random.split(key, 3)
        s1 = 1.0 / jnp.sqrt(jnp.float32(input_dim))
        s2 = 1.0 / jnp.sqrt(jnp.float32(hidden_dim))
        w1 = jax.random.uniform(k1, (input_dim, hidden_dim), jnp.float32, -s1, s1)
        b1 = jnp.zeros((1, hidden_dim), jnp.float32)
        w2 = jax.random.uniform(k2, (hidden_dim, out_dim), jnp.float32, -s2, s2)
        b2 = jnp.zeros((1, out_dim), jnp.float32)
        backbone_params.append((w1, b1, w2, b2))
    # CosineClassifier.reset_parameters: uniform(-stdv, stdv), stdv = 1/sqrt(in_features)
    feat_dim = out_dim * n_nets
    kw, key = jax.random.split(key)
    stdv = 1.0 / jnp.sqrt(jnp.float32(feat_dim))
    classifier_weight = jax.random.uniform(
        kw, (n_classes, feat_dim), jnp.float32, -stdv, stdv)
    return backbone_params, classifier_weight


if __name__ == "__main__":
    key = jax.random.PRNGKey(0)

    batch = 2
    input_dim = 32
    hidden_dim = 64
    out_dim = 32          # backbone 'attention' feature dim
    n_nets = 2            # dynamical representation expansion: two backbones
    n_classes = 8

    kx, kp = jax.random.split(key)
    x = jax.random.normal(kx, (batch, input_dim), dtype=jnp.float32)
    backbone_params, classifier_weight = init_params(
        kp, n_nets, input_dim, hidden_dim, out_dim, n_classes)

    out = expandable_net_forward(x, backbone_params, classifier_weight)
    jax.block_until_ready(out)

    assert out["attentions"].shape == (batch, out_dim * n_nets)
    assert out["logits"].shape == (batch, n_classes)

    # Pure-JAX f32 reference (kernel uses bf16 matmul operands -> loose tol).
    def ref_forward(x, params, w):
        feats = []
        for (w1, b1, w2, b2) in params:
            h = jnp.maximum(x @ w1 + b1, 0.0)
            feats.append(h @ w2 + b2)
        a = jnp.concatenate(feats, axis=1)
        a_n = a / jnp.maximum(jnp.linalg.norm(a, axis=1, keepdims=True), 1e-12)
        w_n = w / jnp.maximum(jnp.linalg.norm(w, axis=1, keepdims=True), 1e-12)
        return a, a_n @ w_n.T

    ref_att, ref_logits = ref_forward(x, backbone_params, classifier_weight)
    assert jnp.allclose(out["attentions"], ref_att, atol=2e-2, rtol=2e-2)
    assert jnp.allclose(out["logits"], ref_logits, atol=2e-2, rtol=2e-2)

    print("KERNEL_OK")
</pallas_src>

<mosaic_0001>
module attributes {stable_mosaic.version = 11 : i64} {
  func.func @_fused_forward_kernel(%arg0: memref<8x128xf32, #tpu.memory_space<vmem>>, %arg1: memref<2x128x128xbf16, #tpu.memory_space<vmem>>, %arg2: memref<2x1x128xf32, #tpu.memory_space<vmem>>, %arg3: memref<2x128x128xbf16, #tpu.memory_space<vmem>>, %arg4: memref<2x1x128xf32, #tpu.memory_space<vmem>>, %arg5: memref<256x128xf32, #tpu.memory_space<vmem>>, %arg6: memref<8x256xf32, #tpu.memory_space<vmem>>, %arg7: memref<8x128xf32, #tpu.memory_space<vmem>>) attributes {dimension_semantics = [], scalar_prefetch = 0 : i64, scratch_operands = 0 : i64, tpu.core_type = #tpu.core_type<tc>} {
    %c0 = arith.constant 0 : index
    %c0_0 = arith.constant 0 : index
    %0 = vector.load %arg0[%c0, %c0_0] : memref<8x128xf32, #tpu.memory_space<vmem>>, vector<8x128xf32>
    %1 = arith.truncf %0 : vector<8x128xf32> to vector<8x128xbf16>
    %cst = arith.constant 0.000000e+00 : f32
    %2 = vector.broadcast %cst : f32 to vector<8x1xf32>
    %c0_1 = arith.constant 0 : index
    %c0_2 = arith.constant 0 : index
    %c0_3 = arith.constant 0 : index
    %3 = vector.load %arg1[%c0_1, %c0_2, %c0_3] : memref<2x128x128xbf16, #tpu.memory_space<vmem>>, vector<1x128x128xbf16>
    %4 = vector.shape_cast %3 : vector<1x128x128xbf16> to vector<128x128xbf16>
    %cst_4 = arith.constant dense<0.000000e+00> : vector<8x128xf32>
    %5 = tpu.matmul %1, %4, %cst_4 {dimension_numbers = #tpu.dot_dimension_numbers<[1], [0], [0], [1], [0, 0, 1, 1], [], []>} : vector<8x128xbf16>, vector<128x128xbf16>, vector<8x128xf32> -> vector<8x128xf32>
    %c0_5 = arith.constant 0 : index
    %c0_6 = arith.constant 0 : index
    %c0_7 = arith.constant 0 : index
    %6 = vector.load %arg2[%c0_5, %c0_6, %c0_7] : memref<2x1x128xf32, #tpu.memory_space<vmem>>, vector<1x1x128xf32>
    %7 = vector.shape_cast %6 : vector<1x1x128xf32> to vector<1x128xf32>
    %8 = vector.broadcast %7 : vector<1x128xf32> to vector<8x128xf32>
    %9 = arith.addf %5, %8 : vector<8x128xf32>
    %cst_8 = arith.constant 0.000000e+00 : f32
    %10 = vector.broadcast %cst_8 : f32 to vector<8x128xf32>
    %11 = arith.maximumf %9, %10 : vector<8x128xf32>
    %12 = arith.truncf %11 : vector<8x128xf32> to vector<8x128xbf16>
    %c0_9 = arith.constant 0 : index
    %c0_10 = arith.constant 0 : index
    %c0_11 = arith.constant 0 : index
    %13 = vector.load %arg3[%c0_9, %c0_10, %c0_11] : memref<2x128x128xbf16, #tpu.memory_space<vmem>>, vector<1x128x128xbf16>
    %14 = vector.shape_cast %13 : vector<1x128x128xbf16> to vector<128x128xbf16>
    %cst_12 = arith.constant dense<0.000000e+00> : vector<8x128xf32>
    %15 = tpu.matmul %12, %14, %cst_12 {dimension_numbers = #tpu.dot_dimension_numbers<[1], [0], [0], [1], [0, 0, 1, 1], [], []>} : vector<8x128xbf16>, vector<128x128xbf16>, vector<8x128xf32> -> vector<8x128xf32>
    %c0_13 = arith.constant 0 : index
    %c0_14 = arith.constant 0 : index
    %c0_15 = arith.constant 0 : index
    %16 = vector.load %arg4[%c0_13, %c0_14, %c0_15] : memref<2x1x128xf32, #tpu.memory_space<vmem>>, vector<1x1x128xf32>
    %17 = vector.shape_cast %16 : vector<1x1x128xf32> to vector<1x128xf32>
    %18 = vector.broadcast %17 : vector<1x128xf32> to vector<8x128xf32>
    %19 = arith.addf %15, %18 : vector<8x128xf32>
    %c0_16 = arith.constant 0 : index
    %c0_17 = arith.constant 0 : index
    %20 = vector.load %arg6[%c0_16, %c0_17] : memref<8x256xf32, #tpu.memory_space<vmem>>, vector<8x128xf32>
    tpu.vector_store %arg6[%c0_16, %c0_17], %19 {strides = array<i32>} : memref<8x256xf32, #tpu.memory_space<vmem>>, vector<8x128xf32>,
    %21 = arith.mulf %19, %19 : vector<8x128xf32>
    %cst_18 = arith.constant dense<0.000000e+00> : vector<8xf32>
    %22 = vector.multi_reduction <add>, %21, %cst_18 [1] : vector<8x128xf32> to vector<8xf32>
    %23 = vector.shape_cast %22 : vector<8xf32> to vector<8x1xf32>
    %24 = arith.addf %2, %23 : vector<8x1xf32>
    %c1 = arith.constant 1 : index
    %c0_19 = arith.constant 0 : index
    %c0_20 = arith.constant 0 : index
    %25 = vector.load %arg1[%c1, %c0_19, %c0_20] : memref<2x128x128xbf16, #tpu.memory_space<vmem>>, vector<1x128x128xbf16>
    %26 = vector.shape_cast %25 : vector<1x128x128xbf16> to vector<128x128xbf16>
    %cst_21 = arith.constant dense<0.000000e+00> : vector<8x128xf32>
    %27 = tpu.matmul %1, %26, %cst_21 {dimension_numbers = #tpu.dot_dimension_numbers<[1], [0], [0], [1], [0, 0, 1, 1], [], []>} : vector<8x128xbf16>, vector<128x128xbf16>, vector<8x128xf32> -> vector<8x128xf32>
    %c1_22 = arith.constant 1 : index
    %c0_23 = arith.constant 0 : index
    %c0_24 = arith.constant 0 : index
    %28 = vector.load %arg2[%c1_22, %c0_23, %c0_24] : memref<2x1x128xf32, #tpu.memory_space<vmem>>, vector<1x1x128xf32>
    %29 = vector.shape_cast %28 : vector<1x1x128xf32> to vector<1x128xf32>
    %30 = vector.broadcast %29 : vector<1x128xf32> to vector<8x128xf32>
    %31 = arith.addf %27, %30 : vector<8x128xf32>
    %cst_25 = arith.constant 0.000000e+00 : f32
    %32 = vector.broadcast %cst_25 : f32 to vector<8x128xf32>
    %33 = arith.maximumf %31, %32 : vector<8x128xf32>
    %34 = arith.truncf %33 : vector<8x128xf32> to vector<8x128xbf16>
    %c1_26 = arith.constant 1 : index
    %c0_27 = arith.constant 0 : index
    %c0_28 = arith.constant 0 : index
    %35 = vector.load %arg3[%c1_26, %c0_27, %c0_28] : memref<2x128x128xbf16, #tpu.memory_space<vmem>>, vector<1x128x128xbf16>
    %36 = vector.shape_cast %35 : vector<1x128x128xbf16> to vector<128x128xbf16>
    %cst_29 = arith.constant dense<0.000000e+00> : vector<8x128xf32>
    %37 = tpu.matmul %34, %36, %cst_29 {dimension_numbers = #tpu.dot_dimension_numbers<[1], [0], [0], [1], [0, 0, 1, 1], [], []>} : vector<8x128xbf16>, vector<128x128xbf16>, vector<8x128xf32> -> vector<8x128xf32>
    %c1_30 = arith.constant 1 : index
    %c0_31 = arith.constant 0 : index
    %c0_32 = arith.constant 0 : index
    %38 = vector.load %arg4[%c1_30, %c0_31, %c0_32] : memref<2x1x128xf32, #tpu.memory_space<vmem>>, vector<1x1x128xf32>
    %39 = vector.shape_cast %38 : vector<1x1x128xf32> to vector<1x128xf32>
    %40 = vector.broadcast %39 : vector<1x128xf32> to vector<8x128xf32>
    %41 = arith.addf %37, %40 : vector<8x128xf32>
    %c0_33 = arith.constant 0 : index
    %c128 = arith.constant 128 : index
    %42 = vector.load %arg6[%c0_33, %c128] : memref<8x256xf32, #tpu.memory_space<vmem>>, vector<8x128xf32>
    tpu.vector_store %arg6[%c0_33, %c128], %41 {strides = array<i32>} : memref<8x256xf32, #tpu.memory_space<vmem>>, vector<8x128xf32>,
    %43 = arith.mulf %41, %41 : vector<8x128xf32>
    %cst_34 = arith.constant dense<0.000000e+00> : vector<8xf32>
    %44 = vector.multi_reduction <add>, %43, %cst_34 [1] : vector<8x128xf32> to vector<8xf32>
    %45 = vector.shape_cast %44 : vector<8xf32> to vector<8x1xf32>
    %46 = arith.addf %24, %45 : vector<8x1xf32>
    %c0_35 = arith.constant 0 : index
    %c0_36 = arith.constant 0 : index
    %47 = vector.load %arg5[%c0_35, %c0_36] : memref<256x128xf32, #tpu.memory_space<vmem>>, vector<256x128xf32>
    %48 = arith.mulf %47, %47 : vector<256x128xf32>
    %cst_37 = arith.constant dense<0.000000e+00> : vector<128xf32>
    %49 = vector.multi_reduction <add>, %48, %cst_37 [0] : vector<256x128xf32> to vector<128xf32>
    %50 = vector.shape_cast %49 : vector<128xf32> to vector<1x128xf32>
    %cst_38 = arith.constant 1.000000e-24 : f32
    %51 = vector.broadcast %cst_38 : f32 to vector<1x128xf32>
    %52 = arith.maximumf %50, %51 : vector<1x128xf32>
    %53 = math.rsqrt %52 : vector<1x128xf32>
    %54 = vector.broadcast %53 : vector<1x128xf32> to vector<256x128xf32>
    %55 = arith.mulf %47, %54 : vector<256x128xf32>
    %56 = arith.truncf %55 : vector<256x128xf32> to vector<256x128xbf16>
    %cst_39 = arith.constant 0.000000e+00 : f32
    %57 = vector.broadcast %cst_39 : f32 to vector<8x128xf32>
    %58 = arith.truncf %19 : vector<8x128xf32> to vector<8x128xbf16>
    %59 = vector.extract_strided_slice %56 {offsets = [0, 0], sizes = [128, 128], strides = [1, 1]} : vector<256x128xbf16> to vector<128x128xbf16>
    %cst_40 = arith.constant dense<0.000000e+00> : vector<8x128xf32>
    %60 = tpu.matmul %58, %59, %cst_40 {dimension_numbers = #tpu.dot_dimension_numbers<[1], [0], [0], [1], [0, 0, 1, 1], [], []>} : vector<8x128xbf16>, vector<128x128xbf16>, vector<8x128xf32> -> vector<8x128xf32>
    %61 = arith.addf %57, %60 : vector<8x128xf32>
    %62 = arith.truncf %41 : vector<8x128xf32> to vector<8x128xbf16>
    %63 = vector.extract_strided_slice %56 {offsets = [128, 0], sizes = [128, 128], strides = [1, 1]} : vector<256x128xbf16> to vector<128x128xbf16>
    %cst_41 = arith.constant dense<0.000000e+00> : vector<8x128xf32>
    %64 = tpu.matmul %62, %63, %cst_41 {dimension_numbers = #tpu.dot_dimension_numbers<[1], [0], [0], [1], [0, 0, 1, 1], [], []>} : vector<8x128xbf16>, vector<128x128xbf16>, vector<8x128xf32> -> vector<8x128xf32>
    %65 = arith.addf %61, %64 : vector<8x128xf32>
    %cst_42 = arith.constant 1.000000e-24 : f32
    %66 = vector.broadcast %cst_42 : f32 to vector<8x1xf32>
    %67 = arith.maximumf %46, %66 : vector<8x1xf32>
    %68 = math.rsqrt %67 : vector<8x1xf32>
    %69 = vector.broadcast %68 : vector<8x1xf32> to vector<8x128xf32>
    %70 = arith.mulf %65, %69 : vector<8x128xf32>
    %c0_43 = arith.constant 0 : index
    %c0_44 = arith.constant 0 : index
    %71 = vector.load %arg7[%c0_43, %c0_44] : memref<8x128xf32, #tpu.memory_space<vmem>>, vector<8x128xf32>
    tpu.vector_store %arg7[%c0_43, %c0_44], %70 {strides = array<i32>} : memref<8x128xf32, #tpu.memory_space<vmem>>, vector<8x128xf32>,
    return
  }
}

</mosaic_0001>

<bundles_post_ra>
// kernel: expandable_net_forward.1
= control target key start
LH: loop header
LB: loop body
LE: loop exit
PB: predicated region body
PF: predicated region fallthrough
CT: control target
= control target key end

     0   :  { %s1327_s1 = inlined_call_operand.vmem [shape: bf16[2,128,128], index: 1, kind: input, shape index: {}]   ;;  %s1328_s3 = inlined_call_operand.vmem [shape: bf16[2,128,128], index: 3, kind: input, shape index: {}]   ;;  %s1329_s2 = inlined_call_operand.vmem [shape: f32[2,1,128], index: 2, kind: input, shape index: {}]   ;;  %s1330_s0 = inlined_call_operand.vmem [shape: f32[8,128], index: 0, kind: input, shape index: {}]   ;;  %s1331_s5 = inlined_call_operand.vmem [shape: f32[256,128], index: 5, kind: input, shape index: {}]   ;;  %s1332_s4 = inlined_call_operand.vmem [shape: f32[2,1,128], index: 4, kind: input, shape index: {}]   ;;  %s1333_s6 = inlined_call_operand.vmem [shape: f32[8,256], index: 6, kind: output, shape index: {0}]   ;;  %s1334_s7 = inlined_call_operand.vmem [shape: f32[8,128], index: 7, kind: output, shape index: {1}]  }
   0x1   :  { %v859_v0 = vld [vmem:[%s1327_s1 + $0x38] sm:$0xff]  ;;  %v858_v2 = vld [vmem:[%s1327_s1 + $0x30] sm:$0xff]  ;;  %v857_v5 = vld [vmem:[%s1327_s1 + $0x28] sm:$0xff] }
   0x2   :  { %v875_v1 = vld [vmem:[%s1327_s1 + $0x78] sm:$0xff]  ;;  %95 = vmatpush.bf16.msra.mxu0 %v859_v0  ;;  %v874_v3 = vld [vmem:[%s1327_s1 + $0x70] sm:$0xff]  ;;  %v873_v6 = vld [vmem:[%s1327_s1 + $0x68] sm:$0xff] }
   0x3   :  { %266 = vmatpush.bf16.msra.mxu2 %v875_v1  ;;  %v867_v4 = vld [vmem:[%s1328_s3 + $0x38] sm:$0xff]  ;;  %v866_v8 = vld [vmem:[%s1328_s3 + $0x30] sm:$0xff]  ;;  %v856_v10 = vld [vmem:[%s1327_s1 + $0x20] sm:$0xff] }
   0x4   :  { %v883_v7 = vld [vmem:[%s1328_s3 + $0x78] sm:$0xff]  ;;  %178 = vmatpush.bf16.msra.mxu1 %v867_v4  ;;  %v882_v9 = vld [vmem:[%s1328_s3 + $0x70] sm:$0xff]  ;;  %v872_v11 = vld [vmem:[%s1327_s1 + $0x60] sm:$0xff] }
   0x5   :  { %351 = vmatpush.bf16.msra.mxu3 %v883_v7  ;;  %v865_v12 = vld [vmem:[%s1328_s3 + $0x28] sm:$0xff]  ;;  %v855_v14 = vld [vmem:[%s1327_s1 + $0x18] sm:$0xff]  ;;  %v864_v16 = vld [vmem:[%s1328_s3 + $0x20] sm:$0xff] }
   0x6   :  { %96 = vmatpush.bf16.msra.mxu0 %v858_v2  ;;  %v881_v13 = vld [vmem:[%s1328_s3 + $0x68] sm:$0xff]  ;;  %v871_v15 = vld [vmem:[%s1327_s1 + $0x58] sm:$0xff]  ;;  %v880_v17 = vld [vmem:[%s1328_s3 + $0x60] sm:$0xff] }
   0x7   :  { %267 = vmatpush.bf16.msra.mxu2 %v874_v3  ;;  %v854_v18 = vld [vmem:[%s1327_s1 + $0x10] sm:$0xff]  ;;  %v863_v20 = vld [vmem:[%s1328_s3 + $0x18] sm:$0xff]  ;;  %v853_v22 = vld [vmem:[%s1327_s1 + $0x8] sm:$0xff] }
   0x8   :  { %179 = vmatpush.bf16.msra.mxu1 %v866_v8  ;;  %v870_v19 = vld [vmem:[%s1327_s1 + $0x50] sm:$0xff]  ;;  %v879_v21 = vld [vmem:[%s1328_s3 + $0x58] sm:$0xff]  ;;  %v869_v23 = vld [vmem:[%s1327_s1 + $0x48] sm:$0xff] }
   0x9   :  { %352 = vmatpush.bf16.msra.mxu3 %v882_v9  ;;  %v862_v24 = vld [vmem:[%s1328_s3 + $0x10] sm:$0xff]  ;;  %v852_v25 = vld [vmem:[%s1327_s1] sm:$0xff]  ;;  %v861_v29 = vld [vmem:[%s1328_s3 + $0x8] sm:$0xff] }
   0xa   :  { %97 = vmatpush.bf16.msra.mxu0 %v857_v5  ;;  %v868_v26 = vld [vmem:[%s1327_s1 + $0x40] sm:$0xff]  ;;  %v878_v30 = vld [vmem:[%s1328_s3 + $0x50] sm:$0xff]  ;;  %v1030_v32 = vld [vmem:[%s1331_s5 + $0x8] sm:$0xff] }
   0xb   :  { %268 = vmatpush.bf16.msra.mxu2 %v873_v6  ;;  %v25_v27 = vld [vmem:[%s1330_s0] sm:$0xff]  ;;  %v402_v35 = vmul.f32 %v1030_v32, %v1030_v32  ;;  %v1042_v36 = vld [vmem:[%s1331_s5 + $0x10] sm:$0xff]  ;;  %v877_v37 = vld [vmem:[%s1328_s3 + $0x48] sm:$0xff] }
   0xc   :  { %180 = vmatpush.bf16.msra.mxu1 %v865_v12  ;;  %v26_v28 = vpack.c.bf16 %v25_v27, %v25_v27  ;;  %v1025_v31 = vld [vmem:[%s1331_s5] sm:$0xff]  ;;  %v403_v38 = vmul.f32 %v1042_v36, %v1042_v36  ;;  %v1052_v40 = vld [vmem:[%s1331_s5 + $0x18] sm:$0xff]  ;;  %v1069_v47 = vld [vmem:[%s1331_s5 + $0x28] sm:$0xff] }
   0xd   :  { %353 = vmatpush.bf16.msra.mxu3 %v881_v13  ;;  %v860_v33 = vld [vmem:[%s1328_s3] sm:$0xff]  ;;  %v401_v34 = vmul.f32 %v1025_v31, %v1025_v31  ;;  %v404_v41 = vmul.f32 %v1052_v40, %v1052_v40  ;;  %v406_v48 = vmul.f32 %v1069_v47, %v1069_v47  ;;  %v1076_v50 = vld [vmem:[%s1331_s5 + $0x30] sm:$0xff]  ;;  %v1083_v53 = vld [vmem:[%s1331_s5 + $0x38] sm:$0xff] }
   0xe   :  { %98 = vmatpush.bf16.msra.mxu0 %v856_v10  ;;  %v1059_v43 = vld [vmem:[%s1331_s5 + $0x20] sm:$0xff]  ;;  %v407_v51 = vmul.f32 %v1076_v50, %v1076_v50  ;;  %v1093_v55 = vld [vmem:[%s1331_s5 + $0x48] sm:$0xff]  ;;  %v408_v56 = vmul.f32 %v1083_v53, %v1083_v53  ;;  %v1100_v58 = vld [vmem:[%s1331_s5 + $0x50] sm:$0xff] }
   0xf   :  { %269 = vmatpush.bf16.msra.mxu2 %v872_v11  ;;  %v433_v39 = vadd.f32 %v402_v35, %v401_v34  ;;  %v876_v44 = vld [vmem:[%s1328_s3 + $0x40] sm:$0xff]  ;;  %v405_v45 = vmul.f32 %v1059_v43, %v1059_v43  ;;  %v410_v60 = vmul.f32 %v1093_v55, %v1093_v55  ;;  %v1109_v62 = vld [vmem:[%s1331_s5 + $0x58] sm:$0xff]  ;;  %v411_v63 = vmul.f32 %v1100_v58, %v1100_v58  ;;  %v1123_v4 = vld [vmem:[%s1331_s5 + $0x68] sm:$0xff] }
  0x10   :  { %181 = vmatpush.bf16.msra.mxu1 %v864_v16  ;;  %v1088_v54 = vld [vmem:[%s1331_s5 + $0x40] sm:$0xff]  ;;  %v412_v2 = vmul.f32 %v1109_v62, %v1109_v62  ;;  %v1130_v7 = vld [vmem:[%s1331_s5 + $0x70] sm:$0xff]  ;;  %v414_v8 = vmul.f32 %v1123_v4, %v1123_v4  ;;  %v1137_v10 = vld [vmem:[%s1331_s5 + $0x78] sm:$0xff] }
  0x11   :  { %354 = vmatpush.bf16.msra.mxu3 %v880_v17  ;;  %v434_v42 = vadd.f32 %v433_v39, %v403_v38  ;;  %v409_v59 = vmul.f32 %v1088_v54, %v1088_v54  ;;  %v1116_v1 = vld [vmem:[%s1331_s5 + $0x60] sm:$0xff]  ;;  %v415_v11 = vmul.f32 %v1130_v7, %v1130_v7  ;;  %v1154_v17 = vld [vmem:[%s1331_s5 + $0x88] sm:$0xff] }
  0x12   :  { %99 = vmatpush.bf16.msra.mxu0 %v855_v14  ;;  %v413_v5 = vmul.f32 %v1116_v1, %v1116_v1  ;;  %v1144_v13 = vld [vmem:[%s1331_s5 + $0x80] sm:$0xff]  ;;  %v416_v14 = vmul.f32 %v1137_v10, %v1137_v10 }
  0x13   :  { %270 = vmatpush.bf16.msra.mxu2 %v871_v15  ;;  %v435_v46 = vadd.f32 %v434_v42, %v404_v41  ;;  %v884_v16 = vld [vmem:[%s1329_s2] ss:$0 sm:$0xff] }
  0x14   :  { %182 = vmatpush.bf16.msra.mxu1 %v863_v20  ;;  %v1161_v20 = vld [vmem:[%s1331_s5 + $0x90] sm:$0xff] }
  0x15   :  { %355 = vmatpush.bf16.msra.mxu3 %v879_v21  ;;  %v436_v49 = vadd.f32 %v435_v46, %v405_v45 }
  0x16   :  { %100 = vmatpush.bf16.msra.mxu0 %v854_v18  ;;  %v417_v18 = vmul.f32 %v1144_v13, %v1144_v13 }
  0x17   :  { %271 = vmatpush.bf16.msra.mxu2 %v870_v19  ;;  %v437_v52 = vadd.f32 %v436_v49, %v406_v48 }
  0x18   :  { %183 = vmatpush.bf16.msra.mxu1 %v862_v24 }
  0x19   :  { %356 = vmatpush.bf16.msra.mxu3 %v878_v30  ;;  %v438_v57 = vadd.f32 %v437_v52, %v407_v51  ;;  %v1178_v30 = vld [vmem:[%s1331_s5 + $0xa0] sm:$0xff]  ;;  %v1199_v51 = vld [vmem:[%s1331_s5 + $0xb8] sm:$0xff] }
  0x1a   :  { %101 = vmatpush.bf16.msra.mxu0 %v853_v22  ;;  %v418_v22 = vmul.f32 %v1154_v17, %v1154_v17  ;;  %v421_v39 = vmul.f32 %v1178_v30, %v1178_v30 }
  0x1b   :  { %272 = vmatpush.bf16.msra.mxu2 %v869_v23  ;;  %v439_v61 = vadd.f32 %v438_v57, %v408_v56 }
  0x1c   :  { %184 = vmatpush.bf16.msra.mxu1 %v861_v29  ;;  %v885_v29 = vld [vmem:[%s1329_s2 + $0x1] ss:$0 sm:$0xff] }
  0x1d   :  { %357 = vmatpush.bf16.msra.mxu3 %v877_v37  ;;  %v440_v0 = vadd.f32 %v439_v61, %v409_v59  ;;  %v1185_v37 = vld [vmem:[%s1331_s5 + $0xa8] sm:$0xff]  ;;  %v1206_v59 = vld [vmem:[%s1331_s5 + $0xc0] sm:$0xff] }
  0x1e   :  { %102 = vmatpush.bf16.msra.mxu0 %v852_v25  ;;  %v1168_v25 = vld [vmem:[%s1331_s5 + $0x98] sm:$0xff]  ;;  %v422_v46 = vmul.f32 %v1185_v37, %v1185_v37 }
  0x1f   :  { %273 = vmatpush.bf16.msra.mxu2 %v868_v26  ;;  %v441_v3 = vadd.f32 %v440_v0, %v410_v60  ;;  %v419_v26 = vmul.f32 %v1161_v20, %v1161_v20  ;;  %v424_v60 = vmul.f32 %v1199_v51, %v1199_v51 }
  0x20   :  { %185 = vmatpush.bf16.msra.mxu1 %v860_v33  ;;  %v420_v33 = vmul.f32 %v1168_v25, %v1168_v25 }
  0x21   :  { %103 = vmatmul.bf16.vlgmr.msra.gmra.mxu0 %v26_v28  ;;  %358 = vmatpush.bf16.msra.mxu3 %v876_v44  ;;  %v442_v6 = vadd.f32 %v441_v3, %v411_v63  ;;  %v1192_v44 = vld [vmem:[%s1331_s5 + $0xb0] sm:$0xff]  ;;  %v1213_v63 = vld [vmem:[%s1331_s5 + $0xc8] sm:$0xff] }
  0x22   :  { %274 = vmatmul.bf16.vlgmr.msra.gmra.mxu2 %v26_v28  ;;  %v423_v52 = vmul.f32 %v1192_v44, %v1192_v44 }
  0x23   :  { %v443_v9 = vadd.f32 %v442_v6, %v412_v2  ;;  %v425_v2 = vmul.f32 %v1206_v59, %v1206_v59  ;;  %v426_v6 = vmul.f32 %v1213_v63, %v1213_v63 }
  0x25   :  { %v444_v12 = vadd.f32 %v443_v9, %v413_v5  ;;  %v1220_v5 = vld [vmem:[%s1331_s5 + $0xd0] sm:$0xff]  ;;  %v1227_v9 = vld [vmem:[%s1331_s5 + $0xd8] sm:$0xff] }
  0x27   :  { %v445_v15 = vadd.f32 %v444_v12, %v414_v8 }
  0x29   :  { %v446_v19 = vadd.f32 %v445_v15, %v415_v11  ;;  %v427_v11 = vmul.f32 %v1220_v5, %v1220_v5  ;;  %v428_v15 = vmul.f32 %v1227_v9, %v1227_v9 }
  0x2b   :  { %v447_v23 = vadd.f32 %v446_v19, %v416_v14  ;;  %v1234_v14 = vld [vmem:[%s1331_s5 + $0xe0] sm:$0xff] }
  0x2c   :  { %v429_v19 = vmul.f32 %v1234_v14, %v1234_v14 }
  0x2d   :  { %v448_v27 = vadd.f32 %v447_v23, %v417_v18  ;;  %v398_v18 = vld [vmem:[%s1331_s5 + $0xe8] sm:$0xff] }
  0x2e   :  { %v430_v23 = vmul.f32 %v398_v18, %v398_v18 }
  0x2f   :  { %v449_v34 = vadd.f32 %v448_v27, %v418_v22  ;;  %v399_v22 = vld [vmem:[%s1331_s5 + $0xf0] sm:$0xff] }
  0x30   :  { %v431_v27 = vmul.f32 %v399_v22, %v399_v22 }
  0x31   :  { %v450_v41 = vadd.f32 %v449_v34, %v419_v26  ;;  %v400_v26 = vld [vmem:[%s1331_s5 + $0xf8] sm:$0xff] }
  0x33   :  { %v451_v48 = vadd.f32 %v450_v41, %v420_v33 }
  0x35   :  { %v452_v56 = vadd.f32 %v451_v48, %v421_v39 }
  0x37   :  { %v453_v61 = vadd.f32 %v452_v56, %v422_v46 }
  0x39   :  { %v454_v3 = vadd.f32 %v453_v61, %v423_v52 }
  0x3b   :  { %v455_v8 = vadd.f32 %v454_v3, %v424_v60 }
  0x3d   :  { %v456_v12 = vadd.f32 %v455_v8, %v425_v2 }
  0x9e   :  { %v104_v21 = vpop.f32.mrf.mxu0 }
  0x9f   :  { %v105_v24 = vadd.f32 %v884_v16, %v104_v21  ;;  %v457_v16 = vadd.f32 %v456_v12, %v426_v6 }
  0xa1   :  { %v108_v28 = vmax.f32 %v105_v24, 0.0  ;;  %v458_v21 = vadd.f32 %v457_v16, %v427_v11 }
  0xa3   :  { %v109_v35 = vpack.c.bf16 %v108_v28, %v108_v28  ;;  %v459_v24 = vadd.f32 %v458_v21, %v428_v15 }
  0xa5   :  { %v275_v38 = vpop.f32.mrf.mxu2  ;;  %186 = vmatmul.bf16.vlgmr.msra.gmra.mxu1 %v109_v35  ;;  %v460_v28 = vadd.f32 %v459_v24, %v429_v19 }
  0xa6   :  { %v276_v42 = vadd.f32 %v885_v29, %v275_v38  ;;  %v106_v45 = vpop.f32.mrf.mxu0  ;;  %v432_v29 = vmul.f32 %v400_v26, %v400_v26 }
  0xa7   :  { %v461_v33 = vadd.f32 %v460_v28, %v430_v23 }
  0xa8   :  { %v279_v49 = vmax.f32 %v276_v42, 0.0 }
  0xa9   :  { %v462_v34 = vadd.f32 %v461_v33, %v431_v27 }
  0xaa   :  { %v280_v57 = vpack.c.bf16 %v279_v49, %v279_v49 }
  0xab   :  { %v463_v35 = vadd.f32 %v462_v34, %v432_v29 }
  0xac   :  { %359 = vmatmul.bf16.vlgmr.msra.gmra.mxu3 %v280_v57 }
  0xad   :  { %v277_v0 = vpop.f32.mrf.mxu2  ;;  %v464_v38 = vrot.slane %v463_v35, 4 }
  0xaf   :  { %v465_v39 = vadd.f32 %v464_v38, %v463_v35 }
  0xb1   :  { %v466_v41 = vrot.slane %v465_v39, 2 }
  0xb3   :  { %v467_v42 = vadd.f32 %v466_v41, %v465_v39 }
  0xb5   :  { %v468_v45 = vrot.slane %v467_v42, 1 }
  0xb7   :  { %v469_v46 = vadd.f32 %v468_v45, %v467_v42 }
  0xb9   :  { %v470_v48 = vmax.f32 %v469_v46, 1e-24 }
  0xbb   :  { %888 = vrsqrt.f32 %v470_v48  ;;  %vm477_vm0 = vweird.f32 %v470_v48 }
  0xc1   :  { %v889_v49 = vpop.eup %888 }
  0xc2   :  { %v472_v52 = vmul.f32 %v889_v49, %v470_v48  ;;  %vm478_vm1 = vweird.f32 %v889_v49 }
  0xc3   :  { %vm479_vm2 = vmor %vm477_vm0, %vm478_vm1 }
  0xc4   :  { %v473_v56 = vmul.f32 %v889_v49, %v472_v52 }
  0xc6   :  { %v474_v57 = vmul.f32 0.5, %v473_v56 }
  0xc8   :  { %v475_v60 = vsub.f32 1.5, %v474_v57 }
  0xca   :  { %v476_v61 = vmul.f32 %v889_v49, %v475_v60 }
  0xcc   :  { %v1249_v0 = vsel %vm479_vm2, %v889_v49, %v476_v61 }
  0xcd   :  { %v495_v2 = vmul.f32 %v1249_v0, %v1130_v7  ;;  %v496_v3 = vmul.f32 %v1249_v0, %v1137_v10  ;;  %v493_v6 = vmul.f32 %v1249_v0, %v1116_v1  ;;  %v494_v8 = vmul.f32 %v1249_v0, %v1123_v4 }
  0xce   :  { %v491_v11 = vmul.f32 %v1249_v0, %v1100_v58  ;;  %v492_v12 = vmul.f32 %v1249_v0, %v1109_v62  ;;  %v511_v15 = vmul.f32 %v1249_v0, %v399_v22  ;;  %v512_v16 = vmul.f32 %v1249_v0, %v400_v26 }
  0xcf   :  { %v527_v7 = vpack.c.bf16 %v495_v2, %v495_v2  ;;  %v528_v19 = vpack.c.bf16 %v496_v3, %v496_v3  ;;  %v525_v21 = vpack.c.bf16 %v493_v6, %v493_v6  ;;  %v526_v10 = vpack.c.bf16 %v494_v8, %v494_v8 }
  0xd0   :  { %v523_v23 = vpack.c.bf16 %v491_v11, %v491_v11  ;;  %v524_v24 = vpack.c.bf16 %v492_v12, %v492_v12  ;;  %v543_v1 = vpack.c.bf16 %v511_v15, %v511_v15  ;;  %v544_v27 = vpack.c.bf16 %v512_v16, %v512_v16 }
  0xd1   :  { %v638_v28 = vunpack.c.l.b16 %v527_v7  ;;  %v639_v4 = vunpack.c.l.b16 %v528_v19  ;;  %v636_v29 = vunpack.c.l.b16 %v525_v21  ;;  %v637_v33 = vunpack.c.l.b16 %v526_v10 }
  0xd2   :  { %v634_v58 = vunpack.c.l.b16 %v523_v23  ;;  %v577_v34 = vunpack.c.l.b16 %v543_v1  ;;  %v578_v35 = vunpack.c.l.b16 %v544_v27  ;;  %v635_v38 = vunpack.c.l.b16 %v524_v24 }
  0xd3   :  { %v647_v62 = vpack.c.b16 %v639_v4, %v638_v28  ;;  %v489_v22 = vmul.f32 %v1249_v0, %v1088_v54  ;;  %v490_v26 = vmul.f32 %v1249_v0, %v1093_v55  ;;  %v646_v39 = vpack.c.b16 %v637_v33, %v636_v29 }
  0xd4   :  { %v586_v41 = vpack.c.b16 %v578_v35, %v577_v34  ;;  %v509_v42 = vmul.f32 %v1249_v0, %v1234_v14  ;;  %v510_v45 = vmul.f32 %v1249_v0, %v398_v18  ;;  %v487_v49 = vmul.f32 %v1249_v0, %v1076_v50 }
  0xd5   :  { %656 = vmatpush.bf16.msrb.mxu1 %v647_v62  ;;  %v521_v46 = vpack.c.bf16 %v489_v22, %v489_v22  ;;  %v522_v48 = vpack.c.bf16 %v490_v26, %v490_v26  ;;  %v488_v52 = vmul.f32 %v1249_v0, %v1083_v53  ;;  %v507_v55 = vmul.f32 %v1249_v0, %v1220_v5 }
  0xd6   :  { %595 = vmatpush.bf16.msrb.mxu0 %v586_v41  ;;  %v541_v54 = vpack.c.bf16 %v509_v42, %v509_v42  ;;  %v542_v56 = vpack.c.bf16 %v510_v45, %v510_v45  ;;  %v508_v14 = vmul.f32 %v1249_v0, %v1227_v9  ;;  %v519_v60 = vpack.c.bf16 %v487_v49, %v487_v49 }
  0xd7   :  { %v632_v57 = vunpack.c.l.b16 %v521_v46  ;;  %v633_v18 = vunpack.c.l.b16 %v522_v48  ;;  %v520_v61 = vpack.c.bf16 %v488_v52, %v488_v52  ;;  %v539_v6 = vpack.c.bf16 %v507_v55, %v507_v55 }
  0xd8   :  { %v575_v2 = vunpack.c.l.b16 %v541_v54  ;;  %v576_v3 = vunpack.c.l.b16 %v542_v56  ;;  %v540_v50 = vpack.c.bf16 %v508_v14, %v508_v14  ;;  %v645_v8 = vpack.c.b16 %v635_v38, %v634_v58 }
  0xd9   :  { %657 = vmatpush.bf16.msrb.mxu1 %v646_v39  ;;  %v485_v53 = vmul.f32 %v1249_v0, %v1059_v43  ;;  %v573_v12 = vunpack.c.l.b16 %v539_v6  ;;  %v486_v5 = vmul.f32 %v1249_v0, %v1069_v47  ;;  %v644_v9 = vpack.c.b16 %v633_v18, %v632_v57 }
  0xda   :  { %v585_v11 = vpack.c.b16 %v576_v3, %v575_v2  ;;  %v574_v15 = vunpack.c.l.b16 %v540_v50  ;;  %v630_v16 = vunpack.c.l.b16 %v519_v60  ;;  %v505_v7 = vmul.f32 %v1249_v0, %v1206_v59 }
  0xdb   :  { %v506_v19 = vmul.f32 %v1249_v0, %v1213_v63  ;;  %v631_v21 = vunpack.c.l.b16 %v520_v61  ;;  %v483_v43 = vmul.f32 %v1249_v0, %v1042_v36  ;;  %v484_v23 = vmul.f32 %v1249_v0, %v1052_v40 }
  0xdc   :  { %596 = vmatpush.bf16.msrb.mxu0 %v585_v11  ;;  %v584_v10 = vpack.c.b16 %v574_v15, %v573_v12  ;;  %v517_v24 = vpack.c.bf16 %v485_v53, %v485_v53  ;;  %v518_v47 = vpack.c.bf16 %v486_v5, %v486_v5  ;;  %v537_v1 = vpack.c.bf16 %v505_v7, %v505_v7  ;;  %v886_v15 = vld [vmem:[%s1332_s4] ss:$0 sm:$0xff] }
  0xdd   :  { %658 = vmatpush.bf16.msrb.mxu1 %v645_v8  ;;  %v538_v27 = vpack.c.bf16 %v506_v19, %v506_v19  ;;  %v515_v59 = vpack.c.bf16 %v483_v43, %v483_v43  ;;  %v516_v29 = vpack.c.bf16 %v484_v23, %v484_v23  ;;  %v643_v63 = vpack.c.b16 %v631_v21, %v630_v16  ;;  %v887_v16 = vld [vmem:[%s1332_s4 + $0x1] ss:$0 sm:$0xff] }
  0xde   :  { %v571_v28 = vunpack.c.l.b16 %v537_v1  ;;  %v628_v33 = vunpack.c.l.b16 %v517_v24  ;;  %v629_v58 = vunpack.c.l.b16 %v518_v47  ;;  %v503_v38 = vmul.f32 %v1249_v0, %v1192_v44 }
  0xdf   :  { %v572_v4 = vunpack.c.l.b16 %v538_v27  ;;  %v626_v36 = vunpack.c.l.b16 %v515_v59  ;;  %v627_v35 = vunpack.c.l.b16 %v516_v29  ;;  %v504_v22 = vmul.f32 %v1249_v0, %v1199_v51 }
  0xe0   :  { %597 = vmatpush.bf16.msrb.mxu0 %v584_v10  ;;  %v642_v40 = vpack.c.b16 %v629_v58, %v628_v33  ;;  %v481_v26 = vmul.f32 %v1249_v0, %v1025_v31  ;;  %v482_v39 = vmul.f32 %v1249_v0, %v1030_v32  ;;  %v535_v41 = vpack.c.bf16 %v503_v38, %v503_v38 }
  0xe1   :  { %659 = vmatpush.bf16.msrb.mxu1 %v644_v9  ;;  %v583_v34 = vpack.c.b16 %v572_v4, %v571_v28  ;;  %v641_v62 = vpack.c.b16 %v627_v35, %v626_v36  ;;  %v536_v42 = vpack.c.bf16 %v504_v22, %v504_v22  ;;  %v501_v44 = vmul.f32 %v1249_v0, %v1178_v30 }
  0xe2   :  { %v513_v45 = vpack.c.bf16 %v481_v26, %v481_v26  ;;  %v514_v46 = vpack.c.bf16 %v482_v39, %v482_v39  ;;  %v569_v48 = vunpack.c.l.b16 %v535_v41  ;;  %v502_v51 = vmul.f32 %v1249_v0, %v1185_v37 }
  0xe3   :  { %v570_v49 = vunpack.c.l.b16 %v536_v42  ;;  %v533_v55 = vpack.c.bf16 %v501_v44, %v501_v44  ;;  %v499_v32 = vmul.f32 %v1249_v0, %v1161_v20  ;;  %v500_v57 = vmul.f32 %v1249_v0, %v1168_v25 }
  0xe4   :  { %598 = vmatpush.bf16.msrb.mxu0 %v583_v34  ;;  %v624_v52 = vunpack.c.l.b16 %v513_v45  ;;  %v625_v54 = vunpack.c.l.b16 %v514_v46  ;;  %v534_v14 = vpack.c.bf16 %v502_v51, %v502_v51  ;;  %v497_v37 = vmul.f32 %v1249_v0, %v1144_v13 }
  0xe5   :  { %660 = vmatpush.bf16.msrb.mxu1 %v643_v63  ;;  %v582_v56 = vpack.c.b16 %v570_v49, %v569_v48  ;;  %v567_v18 = vunpack.c.l.b16 %v533_v55  ;;  %v531_v61 = vpack.c.bf16 %v499_v32, %v499_v32  ;;  %v532_v2 = vpack.c.bf16 %v500_v57, %v500_v57 }
  0xe6   :  { %v640_v31 = vpack.c.b16 %v625_v54, %v624_v52  ;;  %v568_v60 = vunpack.c.l.b16 %v534_v14  ;;  %v498_v50 = vmul.f32 %v1249_v0, %v1154_v17  ;;  %v529_v53 = vpack.c.bf16 %v497_v37, %v497_v37 }
  0xe7   :  { %v565_v3 = vunpack.c.l.b16 %v531_v61  ;;  %v566_v6 = vunpack.c.l.b16 %v532_v2 }
  0xe8   :  { %599 = vmatpush.bf16.msrb.mxu0 %v582_v56  ;;  %v581_v30 = vpack.c.b16 %v568_v60, %v567_v18  ;;  %v530_v20 = vpack.c.bf16 %v498_v50, %v498_v50  ;;  %v563_v11 = vunpack.c.l.b16 %v529_v53 }
  0xe9   :  { %661 = vmatpush.bf16.msrb.mxu1 %v642_v40  ;;  %v580_v8 = vpack.c.b16 %v566_v6, %v565_v3 }
  0xea   :  { %v564_v12 = vunpack.c.l.b16 %v530_v20 }
  0xec   :  { %600 = vmatpush.bf16.msrb.mxu0 %v581_v30  ;;  %v579_v25 = vpack.c.b16 %v564_v12, %v563_v11 }
  0xed   :  { %662 = vmatpush.bf16.msrb.mxu1 %v641_v62 }
  0xf0   :  { %601 = vmatpush.bf16.msrb.mxu0 %v580_v8 }
  0xf1   :  { %663 = vmatpush.bf16.msrb.mxu1 %v640_v31 }
  0xf4   :  { %602 = vmatpush.bf16.msrb.mxu0 %v579_v25 }
 0x122   :  { %v187_v5 = vpop.f32.mrf.mxu1 }
 0x123   :  { %v188_v9 = vadd.f32 %v886_v15, %v187_v5 }
 0x125   :  { %191 = vst [vmem:[%s1333_s6] sm:$0xff] %v188_v9  ;;  %v545_v13 = vpack.c.bf16 %v188_v9, %v188_v9  ;;  %v192_v17 = vmul.f32 %v188_v9, %v188_v9 }
 0x127   :  { %664 = vmatmul.bf16.vlgmr.msrb.gmra.mxu1 %v545_v13  ;;  %193 = vadd.xlane.f32.xlu0 %v192_v17 }
 0x12a   :  { %v189_v0 = vpop.f32.mrf.mxu1 }
 0x12f   :  { %v360_v7 = vpop.f32.mrf.mxu3 }
 0x130   :  { %v361_v19 = vadd.f32 %v887_v16, %v360_v7 }
 0x132   :  { %364 = vst [vmem:[%s1333_s6 + $0x8] sm:$0xff] %v361_v19  ;;  %v546_v21 = vpack.c.bf16 %v361_v19, %v361_v19  ;;  %v365_v10 = vmul.f32 %v361_v19, %v361_v19 }
 0x134   :  { %603 = vmatmul.bf16.vlgmr.msrb.gmra.mxu0 %v546_v21  ;;  %366 = vadd.xlane.f32.xlu0 %v365_v10 }
 0x137   :  { %v362_v43 = vpop.f32.mrf.mxu3 }
 0x19a   :  { %v194_v23 = vpop.xlane.xlu0 %193 }
 0x1a4   :  { %v665_v24 = vpop.f32.mrf.mxu1 }
 0x1a7   :  { %v367_v47 = vpop.xlane.xlu0 %366 }
 0x1a8   :  { %v368_v1 = vadd.f32 %v367_v47, %v194_v23 }
 0x1aa   :  { %v669_v27 = vmax.f32 %v368_v1, 1e-24 }
 0x1ac   :  { %890 = vrsqrt.f32 %v669_v27  ;;  %v667_v28 = vpop.f32.mrf.mxu1  ;;  %vm676_vm4 = vweird.f32 %v669_v27 }
 0x1b1   :  { %v604_v4 = vpop.f32.mrf.mxu0 }
 0x1b2   :  { %v891_v59 = vpop.eup %890  ;;  %v666_v35 = vadd.f32 %v665_v24, %v604_v4 }
 0x1b3   :  { %v671_v29 = vmul.f32 %v891_v59, %v669_v27  ;;  %vm677_vm3 = vweird.f32 %v891_v59 }
 0x1b4   :  { %vm678_vm5 = vmor %vm676_vm4, %vm677_vm3 }
 0x1b5   :  { %v672_v63 = vmul.f32 %v891_v59, %v671_v29 }
 0x1b7   :  { %v673_v33 = vmul.f32 0.5, %v672_v63 }
 0x1b9   :  { %v674_v58 = vsub.f32 1.5, %v673_v33  ;;  %v606_v34 = vpop.f32.mrf.mxu0 }
 0x1bb   :  { %v675_v36 = vmul.f32 %v891_v59, %v674_v58 }
 0x1bd   :  { %v679_v40 = vsel %vm678_vm5, %v891_v59, %v675_v36 }
 0x1be   :  { %v680_v62 = vmul.f32 %v679_v40, %v666_v35 }
 0x1c0   :  { %681 = vst [vmem:[%s1334_s7] sm:$0xff] %v680_v62 }

</bundles_post_ra>
